<compile_context>
chip_gen: v7x
topology: tpu7x:2x2x1
jax: 0.10.0
libtpu: 0.0.40
codegen_flags: <defaults>
</compile_context>

<pallas_src>
import jax
import jax.numpy as jnp
from jax.experimental import pallas as pl
from jax.experimental.pallas import tpu as pltpu

HIDDEN = 512
NEG_SLOPE = 0.01  # PyTorch F.leaky_relu default


def _leaky_relu(v):
    # maximum(v, a*v) == leaky_relu(v) for 0 < a < 1: 2 VALU ops instead of 3.
    return jnp.maximum(v, NEG_SLOPE * v)


def mine_kernel(x_ref, y_ref, w1x_ref, w1y_ref, b1_ref,
                w2_ref, b2_ref, w3_ref, b3_ref, out_ref):
    # ---- Layer 1: fc1_x(x) + fc1_y(y), bf16 MXU inputs, f32 accumulation ----
    xb = x_ref[...].astype(jnp.bfloat16)
    yb = y_ref[...].astype(jnp.bfloat16)
    acc1 = jnp.dot(xb, w1x_ref[...], preferred_element_type=jnp.float32)
    acc1 = acc1 + jnp.dot(yb, w1y_ref[...], preferred_element_type=jnp.float32)
    # Bias add in f32, then activate on packed bf16 vregs (needed for next dot).
    h1 = _leaky_relu((acc1 + b1_ref[...]).astype(jnp.bfloat16))

    # ---- Layer 2: (TB, 512) @ (512, 512) ----
    acc2 = jnp.dot(h1, w2_ref[...], preferred_element_type=jnp.float32)
    h2 = _leaky_relu((acc2 + b2_ref[...]).astype(jnp.bfloat16))

    # ---- Layer 3 (512 -> 1): VPU multiply + cross-lane reduce (off the MXU).
    # w3 is kept f32 so the products / reduction accumulate in f32.
    h3 = jnp.sum(h2 * w3_ref[...], axis=-1, keepdims=True) + b3_ref[...]
    h3 = _leaky_relu(h3)

    # (TB, 1) block straight into the (B, 1) output — no lane broadcast.
    out_ref[...] = h3.astype(out_ref.dtype)


def _round_up(n, m):
    return ((n + m - 1) // m) * m


def _pick_batch_tile(B, batch_tile):
    """Tile the batch: multiple of 256 (bf16 MXU packing), >= 2 grid steps when
    the batch is large enough (v7x 2-TC sharding), capped by `batch_tile`."""
    if B <= 512 and B <= batch_tile:
        return B                                    # single full-batch tile
    tb = min(batch_tile, _round_up(pl.cdiv(B, 2), 256))
    tb = max(256, (tb // 256) * 256)                # multiple of 256
    return min(tb, _round_up(B, 256))


def mine_forward(x, y, fused, *, batch_tile=2048):
    """x, y: (B, D) float32.  fused: dict from prepare_params()."""
    B, D = x.shape
    TB = _pick_batch_tile(B, batch_tile)
    nb = pl.cdiv(B, TB)

    const = lambda i: (0, 0)     # weights/biases: same block every grid step
    batch = lambda i: (i, 0)     # batch-tiled operands

    out = pl.pallas_call(
        mine_kernel,
        out_shape=jax.ShapeDtypeStruct((B, 1), jnp.float32),
        grid=(nb,),
        in_specs=[
            pl.BlockSpec((TB, D), batch),           # x  (f32)
            pl.BlockSpec((TB, D), batch),           # y  (f32)
            pl.BlockSpec((D, HIDDEN), const),       # w1x (bf16)
            pl.BlockSpec((D, HIDDEN), const),       # w1y (bf16)
            pl.BlockSpec((1, HIDDEN), const),       # b1 = b1x + b1y (f32)
            pl.BlockSpec((HIDDEN, HIDDEN), const),  # w2 (bf16)
            pl.BlockSpec((1, HIDDEN), const),       # b2 (f32)
            pl.BlockSpec((1, HIDDEN), const),       # w3 row (f32)
            pl.BlockSpec((1, 1), const),            # b3 (f32)
        ],
        out_specs=pl.BlockSpec((TB, 1), batch),
        compiler_params=pltpu.CompilerParams(
            dimension_semantics=("parallel",),
            # h1/h2 f32 temporaries at TB=2048 need ~16-18 MiB; raise the
            # scoped-VMEM limit (default is 16 MiB on v5e / 32 MiB on v6e/v7x)
            # while staying well inside v7x's 64 MiB physical VMEM.
            vmem_limit_bytes=40 * 1024 * 1024,
        ),
    )(x, y, fused["w1x"], fused["w1y"], fused["b1"],
      fused["w2"], fused["b2"], fused["w3"], fused["b3"])

    return out


def init_params(key, input_dim):
    """Raw (PyTorch-equivalent) params. Weights stored transposed: (in, out)."""
    ks = jax.random.split(key, 8)

    def lin(kw, kb, fan_in, fan_out):
        bound = 1.0 / jnp.sqrt(jnp.float32(fan_in))
        w = jax.random.uniform(kw, (fan_in, fan_out), jnp.float32, -bound, bound)
        b = jax.random.uniform(kb, (1, fan_out), jnp.float32, -bound, bound)
        return w, b

    w1x, b1x = lin(ks[0], ks[1], input_dim, HIDDEN)
    w1y, b1y = lin(ks[2], ks[3], input_dim, HIDDEN)
    w2, b2 = lin(ks[4], ks[5], HIDDEN, HIDDEN)
    w3, b3 = lin(ks[6], ks[7], HIDDEN, 1)
    return dict(w1x=w1x, b1x=b1x, w1y=w1y, b1y=b1y,
                w2=w2, b2=b2, w3=w3, b3=b3)


def prepare_params(p):
    """One-time (outside the hot path) dtype prep for the kernel."""
    return dict(
        w1x=p["w1x"].astype(jnp.bfloat16),                   # (D, 512)
        w1y=p["w1y"].astype(jnp.bfloat16),                   # (D, 512)
        b1=(p["b1x"] + p["b1y"]).astype(jnp.float32),        # (1, 512)
        w2=p["w2"].astype(jnp.bfloat16),                     # (512, 512)
        b2=p["b2"].astype(jnp.float32),                      # (1, 512)
        w3=p["w3"].reshape(1, HIDDEN).astype(jnp.float32),   # (1, 512)
        b3=p["b3"].reshape(1, 1).astype(jnp.float32),        # (1, 1)
    )


def mine_reference(x, y, p):
    """Full-f32 reference matching the PyTorch module."""
    lrelu = lambda v: jnp.where(v > 0, v, NEG_SLOPE * v)
    h1 = lrelu(x @ p["w1x"] + p["b1x"] + y @ p["w1y"] + p["b1y"])
    h2 = lrelu(h1 @ p["w2"] + p["b2"])
    h3 = lrelu(h2 @ p["w3"] + p["b3"])
    return h3


if __name__ == "__main__":
    INPUT_DIM = 32
    key = jax.random.PRNGKey(0)
    kx, ky, kp = jax.random.split(key, 3)

    raw = init_params(kp, INPUT_DIM)
    fused = prepare_params(raw)

    # Case 1: small single-tile batch.
    B1 = 8
    x1 = jax.random.normal(kx, (B1, INPUT_DIM), jnp.float32)
    y1 = jax.random.normal(ky, (B1, INPUT_DIM), jnp.float32)
    out1 = jax.block_until_ready(mine_forward(x1, y1, fused))
    ref1 = mine_reference(x1, y1, raw)
    assert out1.shape == (B1, 1), out1.shape
    err1 = jnp.max(jnp.abs(out1 - ref1))
    assert jnp.allclose(out1, ref1, atol=3e-2, rtol=3e-2), f"max abs err {err1}"

    # Case 2: multi-tile grid with a ragged last tile (B % TB != 0).
    B2 = 600
    x2 = jax.random.normal(jax.random.PRNGKey(1), (B2, INPUT_DIM), jnp.float32)
    y2 = jax.random.normal(jax.random.PRNGKey(2), (B2, INPUT_DIM), jnp.float32)
    out2 = jax.block_until_ready(mine_forward(x2, y2, fused, batch_tile=256))
    ref2 = mine_reference(x2, y2, raw)
    assert out2.shape == (B2, 1), out2.shape
    err2 = jnp.max(jnp.abs(out2 - ref2))
    assert jnp.allclose(out2, ref2, atol=3e-2, rtol=3e-2), f"max abs err {err2}"

    print("KERNEL_OK")
</pallas_src>

<mosaic_0001>
module attributes {stable_mosaic.version = 11 : i64} {
  func.func @mine_kernel(%arg0: i32, %arg1: memref<8x32xf32, #tpu.memory_space<vmem>>, %arg2: memref<8x32xf32, #tpu.memory_space<vmem>>, %arg3: memref<32x512xbf16, #tpu.memory_space<vmem>>, %arg4: memref<32x512xbf16, #tpu.memory_space<vmem>>, %arg5: memref<1x512xf32, #tpu.memory_space<vmem>>, %arg6: memref<512x512xbf16, #tpu.memory_space<vmem>>, %arg7: memref<1x512xf32, #tpu.memory_space<vmem>>, %arg8: memref<1x512xf32, #tpu.memory_space<vmem>>, %arg9: memref<1x1xf32, #tpu.memory_space<vmem>>, %arg10: memref<8x1xf32, #tpu.memory_space<vmem>>) attributes {dimension_semantics = [#tpu.dimension_semantics<parallel>], iteration_bounds = array<i64: 1>, scalar_prefetch = 0 : i64, scratch_operands = 0 : i64, tpu.core_type = #tpu.core_type<tc>, window_params = [{transform_indices = @transform_0, window_bounds = array<i64: 8, 32>}, {transform_indices = @transform_1, window_bounds = array<i64: 8, 32>}, {pipeline_mode = #tpu.pipeline_mode<synchronous>, transform_indices = @transform_2, window_bounds = array<i64: 32, 512>}, {pipeline_mode = #tpu.pipeline_mode<synchronous>, transform_indices = @transform_3, window_bounds = array<i64: 32, 512>}, {pipeline_mode = #tpu.pipeline_mode<synchronous>, transform_indices = @transform_4, window_bounds = array<i64: 1, 512>}, {pipeline_mode = #tpu.pipeline_mode<synchronous>, transform_indices = @transform_5, window_bounds = array<i64: 512, 512>}, {pipeline_mode = #tpu.pipeline_mode<synchronous>, transform_indices = @transform_6, window_bounds = array<i64: 1, 512>}, {pipeline_mode = #tpu.pipeline_mode<synchronous>, transform_indices = @transform_7, window_bounds = array<i64: 1, 512>}, {pipeline_mode = #tpu.pipeline_mode<synchronous>, transform_indices = @transform_8, window_bounds = array<i64: 1, 1>}, {transform_indices = @transform_9, window_bounds = array<i64: 8, 1>}]} {
    %c0 = arith.constant 0 : index
    %c0_0 = arith.constant 0 : index
    %0 = vector.load %arg1[%c0, %c0_0] : memref<8x32xf32, #tpu.memory_space<vmem>>, vector<8x32xf32>
    %1 = arith.truncf %0 : vector<8x32xf32> to vector<8x32xbf16>
    %c0_1 = arith.constant 0 : index
    %c0_2 = arith.constant 0 : index
    %2 = vector.load %arg2[%c0_1, %c0_2] : memref<8x32xf32, #tpu.memory_space<vmem>>, vector<8x32xf32>
    %3 = arith.truncf %2 : vector<8x32xf32> to vector<8x32xbf16>
    %c0_3 = arith.constant 0 : index
    %c0_4 = arith.constant 0 : index
    %4 = vector.load %arg3[%c0_3, %c0_4] : memref<32x512xbf16, #tpu.memory_space<vmem>>, vector<32x512xbf16>
    %cst = arith.constant dense<0.000000e+00> : vector<8x512xf32>
    %5 = tpu.matmul %1, %4, %cst {dimension_numbers = #tpu.dot_dimension_numbers<[1], [0], [0], [1], [0, 0, 1, 1], [], []>} : vector<8x32xbf16>, vector<32x512xbf16>, vector<8x512xf32> -> vector<8x512xf32>
    %c0_5 = arith.constant 0 : index
    %c0_6 = arith.constant 0 : index
    %6 = vector.load %arg4[%c0_5, %c0_6] : memref<32x512xbf16, #tpu.memory_space<vmem>>, vector<32x512xbf16>
    %cst_7 = arith.constant dense<0.000000e+00> : vector<8x512xf32>
    %7 = tpu.matmul %3, %6, %cst_7 {dimension_numbers = #tpu.dot_dimension_numbers<[1], [0], [0], [1], [0, 0, 1, 1], [], []>} : vector<8x32xbf16>, vector<32x512xbf16>, vector<8x512xf32> -> vector<8x512xf32>
    %8 = arith.addf %5, %7 : vector<8x512xf32>
    %c0_8 = arith.constant 0 : index
    %c0_9 = arith.constant 0 : index
    %9 = vector.load %arg5[%c0_8, %c0_9] : memref<1x512xf32, #tpu.memory_space<vmem>>, vector<1x512xf32>
    %10 = vector.broadcast %9 : vector<1x512xf32> to vector<8x512xf32>
    %11 = arith.addf %8, %10 : vector<8x512xf32>
    %12 = arith.truncf %11 : vector<8x512xf32> to vector<8x512xbf16>
    %cst_10 = arith.constant 1.000980e-02 : bf16
    %13 = vector.broadcast %cst_10 : bf16 to vector<8x512xbf16>
    %14 = arith.mulf %13, %12 : vector<8x512xbf16>
    %15 = arith.maximumf %12, %14 : vector<8x512xbf16>
    %c0_11 = arith.constant 0 : index
    %c0_12 = arith.constant 0 : index
    %16 = vector.load %arg6[%c0_11, %c0_12] : memref<512x512xbf16, #tpu.memory_space<vmem>>, vector<512x512xbf16>
    %cst_13 = arith.constant dense<0.000000e+00> : vector<8x512xf32>
    %17 = tpu.matmul %15, %16, %cst_13 {dimension_numbers = #tpu.dot_dimension_numbers<[1], [0], [0], [1], [0, 0, 1, 1], [], []>} : vector<8x512xbf16>, vector<512x512xbf16>, vector<8x512xf32> -> vector<8x512xf32>
    %c0_14 = arith.constant 0 : index
    %c0_15 = arith.constant 0 : index
    %18 = vector.load %arg7[%c0_14, %c0_15] : memref<1x512xf32, #tpu.memory_space<vmem>>, vector<1x512xf32>
    %19 = vector.broadcast %18 : vector<1x512xf32> to vector<8x512xf32>
    %20 = arith.addf %17, %19 : vector<8x512xf32>
    %21 = arith.truncf %20 : vector<8x512xf32> to vector<8x512xbf16>
    %cst_16 = arith.constant 1.000980e-02 : bf16
    %22 = vector.broadcast %cst_16 : bf16 to vector<8x512xbf16>
    %23 = arith.mulf %22, %21 : vector<8x512xbf16>
    %24 = arith.maximumf %21, %23 : vector<8x512xbf16>
    %c0_17 = arith.constant 0 : index
    %c0_18 = arith.constant 0 : index
    %25 = vector.load %arg8[%c0_17, %c0_18] : memref<1x512xf32, #tpu.memory_space<vmem>>, vector<1x512xf32>
    %26 = arith.extf %24 : vector<8x512xbf16> to vector<8x512xf32>
    %27 = vector.broadcast %25 : vector<1x512xf32> to vector<8x512xf32>
    %28 = arith.mulf %26, %27 : vector<8x512xf32>
    %cst_19 = arith.constant dense<0.000000e+00> : vector<8xf32>
    %29 = vector.multi_reduction <add>, %28, %cst_19 [1] : vector<8x512xf32> to vector<8xf32>
    %30 = vector.shape_cast %29 : vector<8xf32> to vector<8x1xf32>
    %c0_20 = arith.constant 0 : index
    %c0_21 = arith.constant 0 : index
    %31 = vector.load %arg9[%c0_20, %c0_21] : memref<1x1xf32, #tpu.memory_space<vmem>>, vector<1x1xf32>
    %32 = vector.broadcast %31 : vector<1x1xf32> to vector<8x1xf32>
    %33 = arith.addf %30, %32 : vector<8x1xf32>
    %cst_22 = arith.constant 0.00999999977 : f32
    %34 = vector.broadcast %cst_22 : f32 to vector<8x1xf32>
    %35 = arith.mulf %34, %33 : vector<8x1xf32>
    %36 = arith.maximumf %33, %35 : vector<8x1xf32>
    %c0_23 = arith.constant 0 : index
    %c0_24 = arith.constant 0 : index
    %37 = vector.load %arg10[%c0_23, %c0_24] : memref<8x1xf32, #tpu.memory_space<vmem>>, vector<8x1xf32>
    tpu.vector_store %arg10[%c0_23, %c0_24], %36 {strides = array<i32>} : memref<8x1xf32, #tpu.memory_space<vmem>>, vector<8x1xf32>,
    return
  }
  func.func @transform_0(%arg0: i32) -> (i32, i32) {
    %c0_i32 = arith.constant 0 : i32
    %c0_i32_0 = arith.constant 0 : i32
    return %arg0, %c0_i32 : i32, i32
  }
  func.func @transform_1(%arg0: i32) -> (i32, i32) {
    %c0_i32 = arith.constant 0 : i32
    %c0_i32_0 = arith.constant 0 : i32
    return %arg0, %c0_i32 : i32, i32
  }
  func.func @transform_2(%arg0: i32) -> (i32, i32) {
    %c0_i32 = arith.constant 0 : i32
    %c0_i32_0 = arith.constant 0 : i32
    %c0_i32_1 = arith.constant 0 : i32
    return %c0_i32, %c0_i32_0 : i32, i32
  }
  func.func @transform_3(%arg0: i32) -> (i32, i32) {
    %c0_i32 = arith.constant 0 : i32
    %c0_i32_0 = arith.constant 0 : i32
    %c0_i32_1 = arith.constant 0 : i32
    return %c0_i32, %c0_i32_0 : i32, i32
  }
  func.func @transform_4(%arg0: i32) -> (i32, i32) {
    %c0_i32 = arith.constant 0 : i32
    %c0_i32_0 = arith.constant 0 : i32
    %c0_i32_1 = arith.constant 0 : i32
    return %c0_i32, %c0_i32_0 : i32, i32
  }
  func.func @transform_5(%arg0: i32) -> (i32, i32) {
    %c0_i32 = arith.constant 0 : i32
    %c0_i32_0 = arith.constant 0 : i32
    %c0_i32_1 = arith.constant 0 : i32
    return %c0_i32, %c0_i32_0 : i32, i32
  }
  func.func @transform_6(%arg0: i32) -> (i32, i32) {
    %c0_i32 = arith.constant 0 : i32
    %c0_i32_0 = arith.constant 0 : i32
    %c0_i32_1 = arith.constant 0 : i32
    return %c0_i32, %c0_i32_0 : i32, i32
  }
  func.func @transform_7(%arg0: i32) -> (i32, i32) {
    %c0_i32 = arith.constant 0 : i32
    %c0_i32_0 = arith.constant 0 : i32
    %c0_i32_1 = arith.constant 0 : i32
    return %c0_i32, %c0_i32_0 : i32, i32
  }
  func.func @transform_8(%arg0: i32) -> (i32, i32) {
    %c0_i32 = arith.constant 0 : i32
    %c0_i32_0 = arith.constant 0 : i32
    %c0_i32_1 = arith.constant 0 : i32
    return %c0_i32, %c0_i32_0 : i32, i32
  }
  func.func @transform_9(%arg0: i32) -> (i32, i32) {
    %c0_i32 = arith.constant 0 : i32
    %c0_i32_0 = arith.constant 0 : i32
    return %arg0, %c0_i32 : i32, i32
  }
}

</mosaic_0001>

<bundles_post_ra>
// kernel: tpu_custom_call.1
= control target key start
LH: loop header
LB: loop body
LE: loop exit
PB: predicated region body
PF: predicated region fallthrough
CT: control target
= control target key end

     0   :  { %s2100_s0 = inlined_call_operand.hbm [shape: f32[8,32], index: 0, kind: input, shape index: {}]   ;;  %s2101_s1 = inlined_call_operand.hbm [shape: f32[8,32], index: 1, kind: input, shape index: {}]   ;;  %s2102_s2 = inlined_call_operand.hbm [shape: bf16[32,512], index: 2, kind: input, shape index: {}]   ;;  %s2103_s3 = inlined_call_operand.hbm [shape: bf16[32,512], index: 3, kind: input, shape index: {}]   ;;  %s2104_s4 = inlined_call_operand.vmem [shape: f32[1,512], index: 4, kind: input, shape index: {}]   ;;  %s2105_s5 = inlined_call_operand.hbm [shape: bf16[512,512], index: 5, kind: input, shape index: {}]   ;;  %s2106_s6 = inlined_call_operand.vmem [shape: f32[1,512], index: 6, kind: input, shape index: {}]   ;;  %s2107_s7 = inlined_call_operand.vmem [shape: f32[1,512], index: 7, kind: input, shape index: {}]   ;;  %s2108_s8 = inlined_call_operand.<no memory space> [shape: f32[1,1], index: 8, kind: input, shape index: {}]   ;;  %s2109_s9 = inlined_call_operand.vmem [shape: f32[8,1], index: 9, kind: output, shape index: {}]  }
   0x1   :  { %v14_v0 = vstv %s2108_s8 }
   0x2   :  { %15 = vst [vmem:[#allocation2] sm:$0x1] %v14_v0 }
   0x3   :  { %16 = vsyncpa [#allocation4], 0 }
   0x4   :  { %17 = vsyncpa [#allocation6], 0 }
   0x5   :  { %18 = vsyncpa [#allocation9], 0  ;;  %s1930_s11 = smov [#allocation5]   ;;  %s1814_s15 = scalar_lea.hbm %s2101_s1, 128 }
   0x6   :  { %s35_s12 = sshll.u32 %s1930_s11, 4  ;;  %p1815_p0 = scmp.ne.s32.totalorder %s2101_s1, %s1814_s15  ;;  %s36_s12 = int_to_ptr.vmem [resolvable:$true] %s35_s12 }
   0x7   :  { %p1818_p1 = scmp.lt.u32.totalorder %s1814_s15, %s2101_s1 }
   0x9   :  { %p1820_p2 = pnand %p1818_p1, %p1815_p0 }
   0xb   :  { %1823 = shalt.err (!%p1820_p2)
}
   0xc   :  { %s1824_s8 = scalar_lea.vmem %s36_s12, 128  ;;  %p1829_p4 = scmp.lt.s32.totalorder %s36_s12, %s36_s12 }
   0xd   :  { %p1825_p3 = scmp.ne.s32.totalorder %s36_s12, %s1824_s8  ;;  %p1830_p5 = scmp.lt.s32.totalorder %s1824_s8, %s1824_s8 }
   0xf   :  { %p1831_p6 = por %p1830_p5, %p1829_p4 }
  0x11   :  { %p1832_p7 = pnand %p1831_p6, %p1825_p3 }
  0x13   :  { %1835 = shalt.err (!%p1832_p7)
}
  0x14   :  { %38 = dma.hbm_to_vmem [thread:$0]  %s2101_s1, 128, %s36_s12, [#allocation6]  }
  0x15   :  { %s1931_s22 = smov [#allocation8]   ;;  %s1932_s24 = smov [#allocation3]  }
  0x16   :  { %s56_s23 = sshll.u32 %s1931_s22, 4  ;;  %s25_s25 = sshll.u32 %s1932_s24, 4  ;;  %s57_s23 = int_to_ptr.vmem [resolvable:$true] %s56_s23  ;;  %s26_s25 = int_to_ptr.vmem [resolvable:$true] %s25_s25 }
  0x17   :  { %s1836_s28 = scalar_lea.hbm %s2103_s3, 1024 }
  0x18   :  { %p1837_p8 = scmp.ne.s32.totalorder %s2103_s3, %s1836_s28  ;;  %p1840_p9 = scmp.lt.u32.totalorder %s1836_s28, %s2103_s3 }
  0x1a   :  { %p1842_p10 = pnand %p1840_p9, %p1837_p8 }
  0x1c   :  { %1845 = shalt.err (!%p1842_p10)
}
  0x1d   :  { %s1846_s1 = scalar_lea.vmem %s57_s23, 1024  ;;  %p1851_p12 = scmp.lt.s32.totalorder %s57_s23, %s57_s23 }
  0x1e   :  { %p1847_p11 = scmp.ne.s32.totalorder %s57_s23, %s1846_s1  ;;  %p1852_p13 = scmp.lt.s32.totalorder %s1846_s1, %s1846_s1 }
  0x20   :  { %p1853_p0 = por %p1852_p13, %p1851_p12 }
  0x22   :  { %p1854_p1 = pnand %p1853_p0, %p1847_p11 }
  0x24   :  { %1857 = shalt.err (!%p1854_p1)
}
  0x25   :  { %s1933_s12 = smov 256   ;;  %s1934_s13 = smov 16  }
  0x26   :  { %62 = dma.hbm_to_vmem [thread:$0]  %s2103_s3, 1024, %s57_s23, [#allocation9], %s1933_s12, %s1933_s12, %s1934_s13  }
  0x27   :  { %s1858_s18 = scalar_lea.hbm %s2100_s0, 128 }
  0x28   :  { %p1859_p2 = scmp.ne.s32.totalorder %s2100_s0, %s1858_s18  ;;  %p1862_p3 = scmp.lt.u32.totalorder %s1858_s18, %s2100_s0 }
  0x2a   :  { %p1864_p4 = pnand %p1862_p3, %p1859_p2 }
  0x2c   :  { %1867 = shalt.err (!%p1864_p4)
}
  0x2d   :  { %s1868_s22 = scalar_lea.vmem %s26_s25, 128  ;;  %p1873_p6 = scmp.lt.s32.totalorder %s26_s25, %s26_s25 }
  0x2e   :  { %p1869_p5 = scmp.ne.s32.totalorder %s26_s25, %s1868_s22  ;;  %p1874_p7 = scmp.lt.s32.totalorder %s1868_s22, %s1868_s22 }
  0x30   :  { %p1875_p8 = por %p1874_p7, %p1873_p6 }
  0x32   :  { %p1876_p9 = pnand %p1875_p8, %p1869_p5 }
  0x34   :  { %1879 = shalt.err (!%p1876_p9)
}
  0x35   :  { %28 = dma.hbm_to_vmem [thread:$0]  %s2100_s0, 128, %s26_s25, [#allocation4]  }
  0x36   :  { %s1935_s24 = smov [#allocation7]   ;;  %s1936_s27 = smov [#allocation10]  }
  0x37   :  { %s44_s26 = sshll.u32 %s1935_s24, 4  ;;  %s70_s28 = sshll.u32 %s1936_s27, 4  ;;  %s45_s26 = int_to_ptr.vmem [resolvable:$true] %s44_s26  ;;  %s71_s28 = int_to_ptr.vmem [resolvable:$true] %s70_s28 }
  0x38   :  { %s1880_s10 = scalar_lea.hbm %s2102_s2, 1024 }
  0x39   :  { %p1881_p10 = scmp.ne.s32.totalorder %s2102_s2, %s1880_s10  ;;  %p1884_p11 = scmp.lt.u32.totalorder %s1880_s10, %s2102_s2 }
  0x3b   :  { %p1886_p12 = pnand %p1884_p11, %p1881_p10 }
  0x3d   :  { %1889 = shalt.err (!%p1886_p12)
}
  0x3e   :  { %s1890_s0 = scalar_lea.vmem %s45_s26, 1024  ;;  %p1895_p0 = scmp.lt.s32.totalorder %s45_s26, %s45_s26 }
  0x3f   :  { %p1891_p13 = scmp.ne.s32.totalorder %s45_s26, %s1890_s0  ;;  %p1896_p1 = scmp.lt.s32.totalorder %s1890_s0, %s1890_s0 }
  0x41   :  { %p1897_p2 = por %p1896_p1, %p1895_p0 }
  0x43   :  { %p1898_p3 = pnand %p1897_p2, %p1891_p13 }
  0x45   :  { %1901 = shalt.err (!%p1898_p3)
}
  0x46   :  { %50 = dma.hbm_to_vmem [thread:$0]  %s2102_s2, 1024, %s45_s26, [#allocation6], %s1933_s12, %s1933_s12, %s1934_s13  }
  0x47   :  { %s1902_s19 = scalar_lea.hbm %s2105_s5, 16384 }
  0x48   :  { %p1903_p4 = scmp.ne.s32.totalorder %s2105_s5, %s1902_s19  ;;  %p1906_p5 = scmp.lt.u32.totalorder %s1902_s19, %s2105_s5 }
  0x4a   :  { %p1908_p6 = pnand %p1906_p5, %p1903_p4 }
  0x4c   :  { %1911 = shalt.err (!%p1908_p6)
}
  0x4d   :  { %s1912_s3 = scalar_lea.vmem %s71_s28, 16384  ;;  %p1917_p8 = scmp.lt.s32.totalorder %s71_s28, %s71_s28 }
  0x4e   :  { %p1913_p7 = scmp.ne.s32.totalorder %s71_s28, %s1912_s3  ;;  %p1918_p9 = scmp.lt.s32.totalorder %s1912_s3, %s1912_s3 }
  0x50   :  { %p1919_p10 = por %p1918_p9, %p1917_p8 }
  0x52   :  { %p1920_p11 = pnand %p1919_p10, %p1913_p7 }
  0x54   :  { %1923 = shalt.err (!%p1920_p11)
}
  0x55   :  { %76 = dma.hbm_to_vmem [thread:$0]  %s2105_s5, 16384, %s71_s28, [#allocation9], %s1933_s12, %s1933_s12, %s1934_s13  }
  0x56   :  { %1924 = dma.done.wait [#allocation4], 128  }
  0x57   :  { %1925 = vsyncadd [#allocation4], 4294967168 }
  0x58   :  { %1926 = dma.done.wait [#allocation6], 1152  }
  0x59   :  { %1927 = vsyncadd [#allocation6], 4294966144 }
  0x5a   :  { %1928 = dma.done.wait [#allocation9], 17408  }
  0x5b   :  { %1929 = vsyncadd [#allocation9], 4294949888  ;;  %v1937_v1 = vmov 0   ;;  %v1598_v2 = vld [vmem:[#allocation8 + $0x4] ss:$16 sps:$4 sm:$0xff]   ;;  %v102_v6 = vld [vmem:[#allocation5] sm:$0xff] }
  0x5c   :  { %196 = vmatprep.mubr.bf16.mxu0 %v1937_v1  ;;  %237 = vmatprep.mubr.bf16.mxu1 %v1937_v1  ;;  %v1600_v3 = vld [vmem:[#allocation8] ss:$16 sps:$4 sm:$0xff]   ;;  %v1601_v4 = vld [vmem:[#allocation8 + $0x24] ss:$16 sps:$4 sm:$0xff]   ;;  %v103_v9 = vpack.c.bf16 %v102_v6, %v102_v6  ;;  %v1610_v10 = vld [vmem:[#allocation8 + $0xc] ss:$16 sps:$4 sm:$0xff]  }
  0x5d   :  { %164 = vmatprep.subr.bf16.mxu0 %v1598_v2  ;;  %v1603_v5 = vld [vmem:[#allocation8 + $0x20] ss:$16 sps:$4 sm:$0xff]   ;;  %v1606_v7 = vld [vmem:[#allocation7 + $0x4] ss:$16 sps:$4 sm:$0xff]   ;;  %vm160_vm0 = vcmask 261120   ;;  %205 = vmatprep.subr.bf16.mxu1 %v1610_v10  ;;  %vm1420_vm1 = vcmask 7168  }
  0x5e   :  { %165 = vmatpush1.bf16.msra.mxu0 %v1600_v3  ;;  %v1604_v8 = vld [vmem:[#allocation7] ss:$16 sps:$4 sm:$0xff]   ;;  %v1612_v11 = vld [vmem:[#allocation8 + $0x8] ss:$16 sps:$4 sm:$0xff]   ;;  %v1609_v12 = vld [vmem:[#allocation7 + $0x24] ss:$16 sps:$4 sm:$0xff]  }
  0x5f   :  { %166 = vmatprep.subr.bf16.mxu0 %v1601_v4  ;;  %v1613_v13 = vld [vmem:[#allocation8 + $0x2c] ss:$16 sps:$4 sm:$0xff]   ;;  %v1607_v14 = vld [vmem:[#allocation7 + $0x20] ss:$16 sps:$4 sm:$0xff]   ;;  %206 = vmatpush1.bf16.msra.mxu1 %v1612_v11  ;;  %v1615_v15 = vld [vmem:[#allocation8 + $0x28] ss:$16 sps:$4 sm:$0xff]  }
  0x60   :  { %207 = vmatprep.subr.bf16.mxu1 %v1613_v13  ;;  %v1618_v16 = vld [vmem:[#allocation7 + $0xc] ss:$16 sps:$4 sm:$0xff]   ;;  %v100_v17 = vld [vmem:[#allocation3] sm:$0xff]  ;;  %v1616_v19 = vld [vmem:[#allocation7 + $0x8] ss:$16 sps:$4 sm:$0xff]  }
  0x61   :  { %v1624_v18 = vld [vmem:[#allocation10 + $0x4] ss:$16 sps:$4 sm:$0xff]   ;;  %v101_v20 = vpack.c.bf16 %v100_v17, %v100_v17  ;;  %v1621_v21 = vld [vmem:[#allocation7 + $0x2c] ss:$16 sps:$4 sm:$0xff]   ;;  %v1622_v22 = vld [vmem:[#allocation10] ss:$16 sps:$4 sm:$0xff]  }
  0x62   :  { %167 = vmatpush1.bf16.msra.mxu0 %v1603_v5  ;;  %v1630_v23 = vld [vmem:[#allocation10 + $0x24] ss:$16 sps:$4 sm:$0xff]   ;;  %v1619_v24 = vld [vmem:[#allocation7 + $0x28] ss:$16 sps:$4 sm:$0xff]   ;;  %v1627_v25 = vld [vmem:[#allocation10 + $0xc] ss:$16 sps:$4 sm:$0xff]  }
  0x63   :  { %289 = vmatprep.subr.bf16.mxu0 %v1606_v7  ;;  %208 = vmatpush1.bf16.msra.mxu1 %v1615_v15  ;;  %v1628_v26 = vld [vmem:[#allocation10 + $0x20] ss:$16 sps:$4 sm:$0xff]   ;;  %v1636_v27 = vld [vmem:[#allocation10 + $0x44] ss:$16 sps:$4 sm:$0xff]   ;;  %v1625_v28 = vld [vmem:[#allocation10 + $0x8] ss:$16 sps:$4 sm:$0xff]  }
  0x64   :  { %330 = vmatprep.subr.bf16.mxu1 %v1618_v16  ;;  %v1633_v29 = vld [vmem:[#allocation10 + $0x2c] ss:$16 sps:$4 sm:$0xff]   ;;  %v1634_v30 = vld [vmem:[#allocation10 + $0x40] ss:$16 sps:$4 sm:$0xff]   ;;  %v1642_v31 = vld [vmem:[#allocation10 + $0x64] ss:$16 sps:$4 sm:$0xff]  }
  0x65   :  { %1437 = vmatmul.mubr.msk.bf16.vlgmr.msra.gmra.mrb[0].mxu0 %vm160_vm0, %v103_v9  ;;  %v1631_v32 = vld [vmem:[#allocation10 + $0x28] ss:$16 sps:$4 sm:$0xff]   ;;  %v1639_v33 = vld [vmem:[#allocation10 + $0x4c] ss:$16 sps:$4 sm:$0xff]   ;;  %v1640_v34 = vld [vmem:[#allocation10 + $0x60] ss:$16 sps:$4 sm:$0xff]  }
  0x66   :  { %290 = vmatpush1.bf16.msra.mxu0 %v1604_v8  ;;  %321 = vmatprep.mubr.bf16.mxu0 %v1937_v1  ;;  %v1648_v35 = vld [vmem:[#allocation10 + $0x84] ss:$16 sps:$4 sm:$0xff]   ;;  %v1637_v36 = vld [vmem:[#allocation10 + $0x48] ss:$16 sps:$4 sm:$0xff]   ;;  %v1645_v37 = vld [vmem:[#allocation10 + $0x6c] ss:$16 sps:$4 sm:$0xff]  }
  0x67   :  { %291 = vmatprep.subr.bf16.mxu0 %v1609_v12  ;;  %1438 = vmatmul.mubr.msk.bf16.vlgmr.msra.gmra.mrb[0].mxu1 %vm160_vm0, %v103_v9  ;;  %v1646_v38 = vld [vmem:[#allocation10 + $0x80] ss:$16 sps:$4 sm:$0xff]   ;;  %v1654_v39 = vld [vmem:[#allocation10 + $0xa4] ss:$16 sps:$4 sm:$0xff]   ;;  %v1643_v40 = vld [vmem:[#allocation10 + $0x68] ss:$16 sps:$4 sm:$0xff]  }
  0x68   :  { %331 = vmatpush1.bf16.msra.mxu1 %v1616_v19  ;;  %362 = vmatprep.mubr.bf16.mxu1 %v1937_v1  ;;  %v1651_v41 = vld [vmem:[#allocation10 + $0x8c] ss:$16 sps:$4 sm:$0xff]   ;;  %v1652_v42 = vld [vmem:[#allocation10 + $0xa0] ss:$16 sps:$4 sm:$0xff]   ;;  %v1660_v43 = vld [vmem:[#allocation10 + $0xc4] ss:$16 sps:$4 sm:$0xff]  }
  0x69   :  { %332 = vmatprep.subr.bf16.mxu1 %v1621_v21  ;;  %v1649_v44 = vld [vmem:[#allocation10 + $0x88] ss:$16 sps:$4 sm:$0xff]   ;;  %v1657_v45 = vld [vmem:[#allocation10 + $0xac] ss:$16 sps:$4 sm:$0xff]   ;;  %v1658_v47 = vld [vmem:[#allocation10 + $0xc0] ss:$16 sps:$4 sm:$0xff]  }
  0x6a   :  { %292 = vmatpush1.bf16.msra.mxu0 %v1607_v14  ;;  %v1655_v46 = vld [vmem:[#allocation10 + $0xa8] ss:$16 sps:$4 sm:$0xff]   ;;  %v1663_v48 = vld [vmem:[#allocation10 + $0xcc] ss:$16 sps:$4 sm:$0xff]   ;;  %v1666_v49 = vld [vmem:[#allocation10 + $0xe4] ss:$16 sps:$4 sm:$0xff]  }
  0x6b   :  { %1199 = vmatprep.subr.bf16.mxu0 %v1624_v18  ;;  %v1664_v50 = vld [vmem:[#allocation10 + $0xe0] ss:$16 sps:$4 sm:$0xff]   ;;  %v1672_v51 = vld [vmem:[#allocation10 + $0x104] ss:$16 sps:$4 sm:$0xff]   ;;  %v1661_v52 = vld [vmem:[#allocation10 + $0xc8] ss:$16 sps:$4 sm:$0xff]  }
  0x6c   :  { %333 = vmatpush1.bf16.msra.mxu1 %v1619_v24  ;;  %v1669_v53 = vld [vmem:[#allocation10 + $0xec] ss:$16 sps:$4 sm:$0xff]   ;;  %v1670_v54 = vld [vmem:[#allocation10 + $0x100] ss:$16 sps:$4 sm:$0xff]   ;;  %v1678_v55 = vld [vmem:[#allocation10 + $0x124] ss:$16 sps:$4 sm:$0xff]   ;;  %v373_v24 = vlaneseq }
  0x6d   :  { %1447 = vmatmul.mubr.msk.bf16.vlgmr.msra.gmra.mrb[4].mxu0 %vm160_vm0, %v101_v20  ;;  %1281 = vmatprep.subr.bf16.mxu1 %v1627_v25  ;;  %v1667_v56 = vld [vmem:[#allocation10 + $0xe8] ss:$16 sps:$4 sm:$0xff]   ;;  %v1675_v57 = vld [vmem:[#allocation10 + $0x10c] ss:$16 sps:$4 sm:$0xff]   ;;  %v1676_v58 = vld [vmem:[#allocation10 + $0x120] ss:$16 sps:$4 sm:$0xff]  }
  0x6e   :  { %1200 = vmatpush1.bf16.msra.mxu0 %v1622_v22  ;;  %v1684_v59 = vld [vmem:[#allocation10 + $0x144] ss:$16 sps:$4 sm:$0xff]   ;;  %v1673_v60 = vld [vmem:[#allocation10 + $0x108] ss:$16 sps:$4 sm:$0xff]   ;;  %v1681_v61 = vld [vmem:[#allocation10 + $0x12c] ss:$16 sps:$4 sm:$0xff]  }
  0x6f   :  { %1201 = vmatprep.subr.bf16.mxu0 %v1630_v23  ;;  %1448 = vmatmul.mubr.msk.bf16.vlgmr.msra.gmra.mrb[4].mxu1 %vm160_vm0, %v101_v20  ;;  %v1682_v62 = vld [vmem:[#allocation10 + $0x140] ss:$16 sps:$4 sm:$0xff]   ;;  %v1679_v63 = vld [vmem:[#allocation10 + $0x128] ss:$16 sps:$4 sm:$0xff]   ;;  %v1687_v0 = vld [vmem:[#allocation10 + $0x14c] ss:$16 sps:$4 sm:$0xff]  }
  0x70   :  { %1282 = vmatpush1.bf16.msra.mxu1 %v1625_v28  ;;  %v1685_v1 = vld [vmem:[#allocation10 + $0x148] ss:$16 sps:$4 sm:$0xff]   ;;  %v1690_v2 = vld [vmem:[#allocation10 + $0x164] ss:$16 sps:$4 sm:$0xff]   ;;  %v1693_v3 = vld [vmem:[#allocation10 + $0x16c] ss:$16 sps:$4 sm:$0xff]  }
  0x71   :  { %1283 = vmatprep.subr.bf16.mxu1 %v1633_v29  ;;  %v1688_v4 = vld [vmem:[#allocation10 + $0x160] ss:$16 sps:$4 sm:$0xff]   ;;  %v1691_v5 = vld [vmem:[#allocation10 + $0x168] ss:$16 sps:$4 sm:$0xff]   ;;  %v1696_v6 = vld [vmem:[#allocation10 + $0x184] ss:$16 sps:$4 sm:$0xff]  }
  0x72   :  { %1202 = vmatpush1.bf16.msra.mxu0 %v1628_v26  ;;  %v1699_v7 = vld [vmem:[#allocation10 + $0x18c] ss:$16 sps:$4 sm:$0xff]   ;;  %v1694_v8 = vld [vmem:[#allocation10 + $0x180] ss:$16 sps:$4 sm:$0xff]   ;;  %v1697_v9 = vld [vmem:[#allocation10 + $0x188] ss:$16 sps:$4 sm:$0xff]  }
  0x73   :  { %1203 = vmatprep.subr.bf16.mxu0 %v1636_v27  ;;  %v1702_v10 = vld [vmem:[#allocation10 + $0x1a4] ss:$16 sps:$4 sm:$0xff]   ;;  %v1705_v11 = vld [vmem:[#allocation10 + $0x1ac] ss:$16 sps:$4 sm:$0xff]   ;;  %v1700_v12 = vld [vmem:[#allocation10 + $0x1a0] ss:$16 sps:$4 sm:$0xff]  }
  0x74   :  { %1284 = vmatpush1.bf16.msra.mxu1 %v1631_v32  ;;  %v1703_v13 = vld [vmem:[#allocation10 + $0x1a8] ss:$16 sps:$4 sm:$0xff]   ;;  %v1708_v14 = vld [vmem:[#allocation10 + $0x1c4] ss:$16 sps:$4 sm:$0xff]   ;;  %v1711_v15 = vld [vmem:[#allocation10 + $0x1cc] ss:$16 sps:$4 sm:$0xff]  }
  0x75   :  { %1285 = vmatprep.subr.bf16.mxu1 %v1639_v33  ;;  %v1706_v16 = vld [vmem:[#allocation10 + $0x1c0] ss:$16 sps:$4 sm:$0xff]   ;;  %v1709_v17 = vld [vmem:[#allocation10 + $0x1c8] ss:$16 sps:$4 sm:$0xff]   ;;  %v1714_v18 = vld [vmem:[#allocation10 + $0x1e4] ss:$16 sps:$4 sm:$0xff]  }
  0x76   :  { %1204 = vmatpush1.bf16.msra.mxu0 %v1634_v30  ;;  %v1717_v19 = vld [vmem:[#allocation10 + $0x1ec] ss:$16 sps:$4 sm:$0xff]   ;;  %v1712_v20 = vld [vmem:[#allocation10 + $0x1e0] ss:$16 sps:$4 sm:$0xff]   ;;  %v1715_v21 = vld [vmem:[#allocation10 + $0x1e8] ss:$16 sps:$4 sm:$0xff]  }
  0x77   :  { %1205 = vmatprep.subr.bf16.mxu0 %v1642_v31  ;;  %v1720_v22 = vld [vmem:[#allocation10 + $0x204] ss:$16 sps:$4 sm:$0xff]   ;;  %v1723_v23 = vld [vmem:[#allocation10 + $0x20c] ss:$16 sps:$4 sm:$0xff]   ;;  %v374_v25 = vshrl.u32 %v373_v24, 7 }
  0x78   :  { %1286 = vmatpush1.bf16.msra.mxu1 %v1637_v36  ;;  %v371_v31 = vld [vmem:[%s2104_s4] sm:$0xf] }
  0x79   :  { %1287 = vmatprep.subr.bf16.mxu1 %v1645_v37  ;;  %v2064_v30 = vsub.s32 0, %v374_v25  ;;  %v2069_v32 = vsub.s32 1, %v374_v25  ;;  %v1748_v24 = vld [vmem:[#allocation10 + $0x2a0] ss:$16 sps:$4 sm:$0xff]  }
  0x7a   :  { %1206 = vmatpush1.bf16.msra.mxu0 %v1640_v34 }
  0x7b   :  { %1207 = vmatprep.subr.bf16.mxu0 %v1648_v35  ;;  %v376_v34 = vrot.slane %v371_v31, %v2064_v30  ;;  %v380_v37 = vrot.slane %v371_v31, %v2069_v32 }
  0x7c   :  { %1288 = vmatpush1.bf16.msra.mxu1 %v1643_v40 }
  0x7d   :  { %1289 = vmatprep.subr.bf16.mxu1 %v1651_v41 }
  0x7e   :  { %1208 = vmatpush1.bf16.msra.mxu0 %v1646_v38 }
  0x7f   :  { %1209 = vmatprep.subr.bf16.mxu0 %v1654_v39 }
  0x80   :  { %1290 = vmatpush1.bf16.msra.mxu1 %v1649_v44 }
  0x81   :  { %1291 = vmatprep.subr.bf16.mxu1 %v1657_v45  ;;  %v2075_v45 = vsub.s32 3, %v374_v25 }
  0x82   :  { %1210 = vmatpush1.bf16.msra.mxu0 %v1652_v42  ;;  %v2073_v42 = vsub.s32 2, %v374_v25  ;;  %v1751_v25 = vld [vmem:[#allocation10 + $0x2a8] ss:$16 sps:$4 sm:$0xff]  }
  0x83   :  { %1211 = vmatprep.subr.bf16.mxu0 %v1660_v43 }
  0x84   :  { %1292 = vmatpush1.bf16.msra.mxu1 %v1655_v46 }
  0x85   :  { %1293 = vmatprep.subr.bf16.mxu1 %v1663_v48 }
  0x86   :  { %1212 = vmatpush1.bf16.msra.mxu0 %v1658_v47 }
  0x87   :  { %1213 = vmatprep.subr.bf16.mxu0 %v1666_v49 }
  0x88   :  { %1294 = vmatpush1.bf16.msra.mxu1 %v1661_v52 }
  0x89   :  { %1295 = vmatprep.subr.bf16.mxu1 %v1669_v53  ;;  %v388_v53 = vrot.slane %v371_v31, %v2075_v45 }
  0x8a   :  { %1214 = vmatpush1.bf16.msra.mxu0 %v1664_v50  ;;  %v384_v50 = vrot.slane %v371_v31, %v2073_v42  ;;  %v1762_v31 = vld [vmem:[#allocation10 + $0x2e4] ss:$16 sps:$4 sm:$0xff]  }
  0x8b   :  { %1215 = vmatprep.subr.bf16.mxu0 %v1672_v51 }
  0x8c   :  { %1296 = vmatpush1.bf16.msra.mxu1 %v1667_v56 }
  0x8d   :  { %1297 = vmatprep.subr.bf16.mxu1 %v1675_v57 }
  0x8e   :  { %1216 = vmatpush1.bf16.msra.mxu0 %v1670_v54 }
  0x8f   :  { %1217 = vmatprep.subr.bf16.mxu0 %v1678_v55 }
  0x90   :  { %1298 = vmatpush1.bf16.msra.mxu1 %v1673_v60 }
  0x91   :  { %1299 = vmatprep.subr.bf16.mxu1 %v1681_v61 }
  0x92   :  { %1218 = vmatpush1.bf16.msra.mxu0 %v1676_v58 }
  0x93   :  { %1219 = vmatprep.subr.bf16.mxu0 %v1684_v59 }
  0x94   :  { %1300 = vmatpush1.bf16.msra.mxu1 %v1679_v63  ;;  %v1718_v63 = vld [vmem:[#allocation10 + $0x200] ss:$16 sps:$4 sm:$0xff]  }
  0x95   :  { %1301 = vmatprep.subr.bf16.mxu1 %v1687_v0  ;;  %v1721_v0 = vld [vmem:[#allocation10 + $0x208] ss:$16 sps:$4 sm:$0xff]  }
  0x96   :  { %1220 = vmatpush1.bf16.msra.mxu0 %v1682_v62 }
  0x97   :  { %1221 = vmatprep.subr.bf16.mxu0 %v1690_v2 }
  0x98   :  { %1302 = vmatpush1.bf16.msra.mxu1 %v1685_v1 }
  0x99   :  { %1303 = vmatprep.subr.bf16.mxu1 %v1693_v3  ;;  %v1726_v3 = vld [vmem:[#allocation10 + $0x224] ss:$16 sps:$4 sm:$0xff]  }
  0x9a   :  { %1222 = vmatpush1.bf16.msra.mxu0 %v1688_v4  ;;  %v1729_v4 = vld [vmem:[#allocation10 + $0x22c] ss:$16 sps:$4 sm:$0xff]  }
  0x9b   :  { %1223 = vmatprep.subr.bf16.mxu0 %v1696_v6  ;;  %v1724_v6 = vld [vmem:[#allocation10 + $0x220] ss:$16 sps:$4 sm:$0xff]  }
  0x9c   :  { %1304 = vmatpush1.bf16.msra.mxu1 %v1691_v5 }
  0x9d   :  { %1305 = vmatprep.subr.bf16.mxu1 %v1699_v7  ;;  %v1727_v7 = vld [vmem:[#allocation10 + $0x228] ss:$16 sps:$4 sm:$0xff]  }
  0x9e   :  { %1224 = vmatpush1.bf16.msra.mxu0 %v1694_v8 }
  0x9f   :  { %1225 = vmatprep.subr.bf16.mxu0 %v1702_v10  ;;  %v1735_v10 = vld [vmem:[#allocation10 + $0x24c] ss:$16 sps:$4 sm:$0xff]  }
  0xa0   :  { %1306 = vmatpush1.bf16.msra.mxu1 %v1697_v9  ;;  %v1732_v9 = vld [vmem:[#allocation10 + $0x244] ss:$16 sps:$4 sm:$0xff]  }
  0xa1   :  { %1307 = vmatprep.subr.bf16.mxu1 %v1705_v11 }
  0xa2   :  { %1226 = vmatpush1.bf16.msra.mxu0 %v1700_v12  ;;  %v1730_v12 = vld [vmem:[#allocation10 + $0x240] ss:$16 sps:$4 sm:$0xff]  }
  0xa3   :  { %1227 = vmatprep.subr.bf16.mxu0 %v1708_v14  ;;  %v1738_v14 = vld [vmem:[#allocation10 + $0x264] ss:$16 sps:$4 sm:$0xff]  }
  0xa4   :  { %1308 = vmatpush1.bf16.msra.mxu1 %v1703_v13  ;;  %v1733_v13 = vld [vmem:[#allocation10 + $0x248] ss:$16 sps:$4 sm:$0xff]  }
  0xa5   :  { %1309 = vmatprep.subr.bf16.mxu1 %v1711_v15  ;;  %v1741_v15 = vld [vmem:[#allocation10 + $0x26c] ss:$16 sps:$4 sm:$0xff]  }
  0xa6   :  { %1228 = vmatpush1.bf16.msra.mxu0 %v1706_v16  ;;  %v1736_v16 = vld [vmem:[#allocation10 + $0x260] ss:$16 sps:$4 sm:$0xff]  }
  0xa7   :  { %1229 = vmatprep.subr.bf16.mxu0 %v1714_v18  ;;  %v1744_v18 = vld [vmem:[#allocation10 + $0x284] ss:$16 sps:$4 sm:$0xff]  }
  0xa8   :  { %1310 = vmatpush1.bf16.msra.mxu1 %v1709_v17  ;;  %v1739_v17 = vld [vmem:[#allocation10 + $0x268] ss:$16 sps:$4 sm:$0xff]  }
  0xa9   :  { %1311 = vmatprep.subr.bf16.mxu1 %v1717_v19  ;;  %v1747_v19 = vld [vmem:[#allocation10 + $0x28c] ss:$16 sps:$4 sm:$0xff]  }
  0xaa   :  { %1230 = vmatpush1.bf16.msra.mxu0 %v1712_v20  ;;  %v1742_v20 = vld [vmem:[#allocation10 + $0x280] ss:$16 sps:$4 sm:$0xff]  }
  0xab   :  { %1240 = vmatprep.subr.bf16.mxu0 %v1720_v22  ;;  %v1750_v22 = vld [vmem:[#allocation10 + $0x2a4] ss:$16 sps:$4 sm:$0xff]  }
  0xac   :  { %1312 = vmatpush1.bf16.msra.mxu1 %v1715_v21  ;;  %v1745_v21 = vld [vmem:[#allocation10 + $0x288] ss:$16 sps:$4 sm:$0xff]  }
  0xad   :  { %1322 = vmatprep.subr.bf16.mxu1 %v1723_v23  ;;  %v1753_v23 = vld [vmem:[#allocation10 + $0x2ac] ss:$16 sps:$4 sm:$0xff]  }
 0x138   :  { %v198_v26 = vpop.f32.mrb[0].mxu0 }
 0x139   :  { %v200_v27 = vpop.f32.mrb[1].mxu0 }
 0x13a   :  { %v202_v28 = vpop.f32.mrb[2].mxu0  ;;  %v239_v33 = vpop.f32.mrb[0].mxu1 }
 0x13b   :  { %v203_v29 = vpop.f32.mrb[3].mxu0  ;;  %v241_v35 = vpop.f32.mrb[1].mxu1  ;;  %v1754_v28 = vld [vmem:[#allocation10 + $0x2c0] ss:$16 sps:$4 sm:$0xff]  }
 0x13c   :  { %v243_v38 = vpop.f32.mrb[2].mxu1  ;;  %v1757_v29 = vld [vmem:[#allocation10 + $0x2c8] ss:$16 sps:$4 sm:$0xff]  }
 0x13d   :  { %v244_v41 = vpop.f32.mrb[3].mxu1  ;;  %v1766_v38 = vld [vmem:[#allocation10 + $0x300] ss:$16 sps:$4 sm:$0xff]  }
 0x13e   :  { %v1777_v41 = vld [vmem:[#allocation10 + $0x32c] ss:$16 sps:$4 sm:$0xff]  }
 0x140   :  { %v323_v36 = vpop.f32.mrb[4].mxu0 }
 0x141   :  { %v324_v39 = vadd.f32 %v323_v36, %v198_v26  ;;  %v325_v40 = vpop.f32.mrb[5].mxu0  ;;  %v1756_v26 = vld [vmem:[#allocation10 + $0x2c4] ss:$16 sps:$4 sm:$0xff]  }
 0x142   :  { %v326_v43 = vadd.f32 %v325_v40, %v200_v27  ;;  %v327_v44 = vpop.f32.mrb[6].mxu0  ;;  %v364_v52 = vpop.f32.mrb[4].mxu1  ;;  %v1759_v27 = vld [vmem:[#allocation10 + $0x2cc] ss:$16 sps:$4 sm:$0xff]   ;;  %v1768_v36 = vld [vmem:[#allocation10 + $0x304] ss:$16 sps:$4 sm:$0xff]  }
 0x143   :  { %v393_v46 = vadd.f32 %v376_v34, %v324_v39  ;;  %v328_v47 = vpop.f32.mrb[7].mxu0  ;;  %v365_v55 = vadd.f32 %v364_v52, %v239_v33  ;;  %v366_v56 = vpop.f32.mrb[5].mxu1  ;;  %v1765_v33 = vld [vmem:[#allocation10 + $0x2ec] ss:$16 sps:$4 sm:$0xff]   ;;  %v1760_v34 = vld [vmem:[#allocation10 + $0x2e0] ss:$16 sps:$4 sm:$0xff]  }
 0x144   :  { %v394_v48 = vadd.f32 %v380_v37, %v326_v43  ;;  %v367_v58 = vadd.f32 %v366_v56, %v241_v35  ;;  %v368_v59 = vpop.f32.mrb[6].mxu1  ;;  %v1763_v35 = vld [vmem:[#allocation10 + $0x2e8] ss:$16 sps:$4 sm:$0xff]   ;;  %v1771_v37 = vld [vmem:[#allocation10 + $0x30c] ss:$16 sps:$4 sm:$0xff]  }
 0x145   :  { %v397_v49 = vpack.c.bf16 %v393_v46, %v393_v46  ;;  %v2079_v60 = vadd.f32 %v384_v50, %v365_v55  ;;  %v369_v61 = vpop.f32.mrb[7].mxu1  ;;  %v1769_v39 = vld [vmem:[#allocation10 + $0x308] ss:$16 sps:$4 sm:$0xff]   ;;  %v1774_v40 = vld [vmem:[#allocation10 + $0x324] ss:$16 sps:$4 sm:$0xff]  }
 0x146   :  { %v398_v51 = vpack.c.bf16 %v394_v48, %v394_v48  ;;  %v396_v1 = vadd.f32 %v388_v53, %v367_v58  ;;  %v1772_v43 = vld [vmem:[#allocation10 + $0x320] ss:$16 sps:$4 sm:$0xff]   ;;  %v1775_v44 = vld [vmem:[#allocation10 + $0x328] ss:$16 sps:$4 sm:$0xff]   ;;  %v1780_v46 = vld [vmem:[#allocation10 + $0x344] ss:$16 sps:$4 sm:$0xff]  }
 0x147   :  { %v401_v54 = vmul.bf16 1009007652, %v397_v49  ;;  %v1783_v47 = vld [vmem:[#allocation10 + $0x34c] ss:$16 sps:$4 sm:$0xff]   ;;  %v1778_v48 = vld [vmem:[#allocation10 + $0x340] ss:$16 sps:$4 sm:$0xff]  }
 0x148   :  { %v402_v57 = vmul.bf16 1009007652, %v398_v51  ;;  %v400_v5 = vpack.c.bf16 %v396_v1, %v396_v1  ;;  %v1786_v50 = vld [vmem:[#allocation10 + $0x364] ss:$16 sps:$4 sm:$0xff]   ;;  %v1784_v52 = vld [vmem:[#allocation10 + $0x360] ss:$16 sps:$4 sm:$0xff]  }
 0x149   :  { %v405_v2 = vmax.bf16 %v401_v54, %v397_v49  ;;  %v1781_v49 = vld [vmem:[#allocation10 + $0x348] ss:$16 sps:$4 sm:$0xff]   ;;  %v1792_v54 = vld [vmem:[#allocation10 + $0x384] ss:$16 sps:$4 sm:$0xff]   ;;  %v1795_v55 = vld [vmem:[#allocation10 + $0x38c] ss:$16 sps:$4 sm:$0xff]  }
 0x14a   :  { %v406_v62 = vmax.bf16 %v402_v57, %v398_v51  ;;  %v404_v8 = vmul.bf16 1009007652, %v400_v5  ;;  %v1789_v51 = vld [vmem:[#allocation10 + $0x36c] ss:$16 sps:$4 sm:$0xff]   ;;  %v1787_v53 = vld [vmem:[#allocation10 + $0x368] ss:$16 sps:$4 sm:$0xff]  }
 0x14b   :  { %v1790_v56 = vld [vmem:[#allocation10 + $0x380] ss:$16 sps:$4 sm:$0xff]   ;;  %v1793_v57 = vld [vmem:[#allocation10 + $0x388] ss:$16 sps:$4 sm:$0xff]   ;;  %v1798_v58 = vld [vmem:[#allocation10 + $0x3a4] ss:$16 sps:$4 sm:$0xff]  }
 0x14c   :  { %1231 = vmatprep.mubr.bf16.mxu0 %v406_v62  ;;  %1313 = vmatprep.mubr.bf16.mxu1 %v406_v62  ;;  %v408_v11 = vmax.bf16 %v404_v8, %v400_v5  ;;  %v1801_v59 = vld [vmem:[#allocation10 + $0x3ac] ss:$16 sps:$4 sm:$0xff]   ;;  %v1796_v61 = vld [vmem:[#allocation10 + $0x3a0] ss:$16 sps:$4 sm:$0xff]   ;;  %v1799_v62 = vld [vmem:[#allocation10 + $0x3a8] ss:$16 sps:$4 sm:$0xff]  }
 0x14d   :  { %1232 = vmatmul.mubr.bf16.vlgmr.msra.gmra.mrb[8].mxu0 %v405_v2  ;;  %1314 = vmatmul.mubr.bf16.vlgmr.msra.gmra.mrb[8].mxu1 %v405_v2  ;;  %v1802_v1 = vld [vmem:[#allocation10 + $0x3c0] ss:$16 sps:$4 sm:$0xff]   ;;  %v1805_v2 = vld [vmem:[#allocation10 + $0x3c8] ss:$16 sps:$4 sm:$0xff]   ;;  %v1813_v5 = vld [vmem:[#allocation10 + $0x3ec] ss:$16 sps:$4 sm:$0xff]  }
 0x14e   :  { %1241 = vmatpush1.bf16.msra.mxu0 %v1718_v63  ;;  %1323 = vmatpush1.bf16.msra.mxu1 %v1721_v0  ;;  %v1804_v63 = vld [vmem:[#allocation10 + $0x3c4] ss:$16 sps:$4 sm:$0xff]   ;;  %v1807_v0 = vld [vmem:[#allocation10 + $0x3cc] ss:$16 sps:$4 sm:$0xff]  }
 0x14f   :  { %1242 = vmatprep.subr.bf16.mxu0 %v1726_v3  ;;  %1324 = vmatprep.subr.bf16.mxu1 %v1729_v4  ;;  %v399_v3 = vpack.c.bf16 %v2079_v60, %v2079_v60  ;;  %v1810_v4 = vld [vmem:[#allocation10 + $0x3e4] ss:$16 sps:$4 sm:$0xff]   ;;  %v537_v60 = vld [vmem:[%s2106_s6] sm:$0xf] }
 0x150   :  { %1272 = vmatprep.mubr.bf16.mxu0 %v408_v11  ;;  %1354 = vmatprep.mubr.bf16.mxu1 %v408_v11  ;;  %v550_v11 = vrot.slane %v537_v60, %v2073_v42 }
 0x151   :  { %v403_v8 = vmul.bf16 1009007652, %v399_v3 }
 0x152   :  { %1243 = vmatpush1.bf16.msra.mxu0 %v1724_v6  ;;  %1325 = vmatpush1.bf16.msra.mxu1 %v1727_v7  ;;  %v1808_v6 = vld [vmem:[#allocation10 + $0x3e0] ss:$16 sps:$4 sm:$0xff]   ;;  %v1811_v7 = vld [vmem:[#allocation10 + $0x3e8] ss:$16 sps:$4 sm:$0xff]  }
 0x153   :  { %1244 = vmatprep.subr.bf16.mxu0 %v1732_v9  ;;  %1326 = vmatprep.subr.bf16.mxu1 %v1735_v10  ;;  %v407_v9 = vmax.bf16 %v403_v8, %v399_v3  ;;  %v542_v10 = vrot.slane %v537_v60, %v2064_v30 }
 0x156   :  { %1245 = vmatpush1.bf16.msra.mxu0 %v1730_v12  ;;  %1327 = vmatpush1.bf16.msra.mxu1 %v1733_v13  ;;  %v546_v12 = vrot.slane %v537_v60, %v2069_v32  ;;  %v554_v13 = vrot.slane %v537_v60, %v2075_v45 }
 0x157   :  { %1246 = vmatprep.subr.bf16.mxu0 %v1738_v14  ;;  %1328 = vmatprep.subr.bf16.mxu1 %v1741_v15 }
 0x15a   :  { %1247 = vmatpush1.bf16.msra.mxu0 %v1736_v16  ;;  %1329 = vmatpush1.bf16.msra.mxu1 %v1739_v17 }
 0x15b   :  { %1248 = vmatprep.subr.bf16.mxu0 %v1744_v18  ;;  %1330 = vmatprep.subr.bf16.mxu1 %v1747_v19 }
 0x15e   :  { %1249 = vmatpush1.bf16.msra.mxu0 %v1742_v20  ;;  %1331 = vmatpush1.bf16.msra.mxu1 %v1745_v21 }
 0x15f   :  { %1250 = vmatprep.subr.bf16.mxu0 %v1750_v22  ;;  %1332 = vmatprep.subr.bf16.mxu1 %v1753_v23 }
 0x162   :  { %1251 = vmatpush1.bf16.msra.mxu0 %v1748_v24  ;;  %1333 = vmatpush1.bf16.msra.mxu1 %v1751_v25 }
 0x163   :  { %1252 = vmatprep.subr.bf16.mxu0 %v1756_v26  ;;  %1334 = vmatprep.subr.bf16.mxu1 %v1759_v27 }
 0x166   :  { %1253 = vmatpush1.bf16.msra.mxu0 %v1754_v28  ;;  %1335 = vmatpush1.bf16.msra.mxu1 %v1757_v29  ;;  %v1375_v28 = vld [vmem:[%s2107_s7] sm:$0xf] }
 0x167   :  { %1254 = vmatprep.subr.bf16.mxu0 %v1762_v31  ;;  %1336 = vmatprep.subr.bf16.mxu1 %v1765_v33 }
 0x16a   :  { %1255 = vmatpush1.bf16.msra.mxu0 %v1760_v34  ;;  %1337 = vmatpush1.bf16.msra.mxu1 %v1763_v35 }
 0x16b   :  { %1256 = vmatprep.subr.bf16.mxu0 %v1768_v36  ;;  %1338 = vmatprep.subr.bf16.mxu1 %v1771_v37 }
 0x16e   :  { %1257 = vmatpush1.bf16.msra.mxu0 %v1766_v38  ;;  %1339 = vmatpush1.bf16.msra.mxu1 %v1769_v39  ;;  %v1384_v38 = vrot.slane %v1375_v28, %v2064_v30 }
 0x16f   :  { %1258 = vmatprep.subr.bf16.mxu0 %v1774_v40  ;;  %1340 = vmatprep.subr.bf16.mxu1 %v1777_v41  ;;  %v1388_v41 = vrot.slane %v1375_v28, %v2069_v32 }
 0x172   :  { %1259 = vmatpush1.bf16.msra.mxu0 %v1772_v43  ;;  %1341 = vmatpush1.bf16.msra.mxu1 %v1775_v44 }
 0x173   :  { %1260 = vmatprep.subr.bf16.mxu0 %v1780_v46  ;;  %1342 = vmatprep.subr.bf16.mxu1 %v1783_v47 }
 0x176   :  { %1261 = vmatpush1.bf16.msra.mxu0 %v1778_v48  ;;  %1343 = vmatpush1.bf16.msra.mxu1 %v1781_v49  ;;  %v1392_v48 = vrot.slane %v1375_v28, %v2073_v42 }
 0x177   :  { %1262 = vmatprep.subr.bf16.mxu0 %v1786_v50  ;;  %1344 = vmatprep.subr.bf16.mxu1 %v1789_v51 }
 0x17a   :  { %1263 = vmatpush1.bf16.msra.mxu0 %v1784_v52  ;;  %1345 = vmatpush1.bf16.msra.mxu1 %v1787_v53  ;;  %v1396_v52 = vrot.slane %v1375_v28, %v2075_v45 }
 0x17b   :  { %1264 = vmatprep.subr.bf16.mxu0 %v1792_v54  ;;  %1346 = vmatprep.subr.bf16.mxu1 %v1795_v55 }
 0x17e   :  { %1265 = vmatpush1.bf16.msra.mxu0 %v1790_v56  ;;  %1347 = vmatpush1.bf16.msra.mxu1 %v1793_v57  ;;  %v1577_v57 = vld [vmem:[#allocation2] ss:$0 sm:$0xff] }
 0x17f   :  { %1266 = vmatprep.subr.bf16.mxu0 %v1798_v58  ;;  %1348 = vmatprep.subr.bf16.mxu1 %v1801_v59 }
 0x182   :  { %1267 = vmatpush1.bf16.msra.mxu0 %v1796_v61  ;;  %1349 = vmatpush1.bf16.msra.mxu1 %v1799_v62 }
 0x183   :  { %1268 = vmatprep.subr.bf16.mxu0 %v1804_v63  ;;  %1350 = vmatprep.subr.bf16.mxu1 %v1807_v0 }
 0x186   :  { %1269 = vmatpush1.bf16.msra.mxu0 %v1802_v1  ;;  %1351 = vmatpush1.bf16.msra.mxu1 %v1805_v2 }
 0x187   :  { %1270 = vmatprep.subr.bf16.mxu0 %v1810_v4  ;;  %1352 = vmatprep.subr.bf16.mxu1 %v1813_v5 }
 0x18a   :  { %1271 = vmatpush1.bf16.msra.mxu0 %v1808_v6  ;;  %1353 = vmatpush1.bf16.msra.mxu1 %v1811_v7 }
 0x18d   :  { %1273 = vmatmul.mubr.bf16.vlgmr.msra.gmra.mrb[8].mxu0 %v407_v9  ;;  %1355 = vmatmul.mubr.bf16.vlgmr.msra.gmra.mrb[8].mxu1 %v407_v9 }
 0x260   :  { %v1274_v14 = vpop.f32.mrb[8].mxu0  ;;  %v1356_v15 = vpop.f32.mrb[8].mxu1 }
 0x261   :  { %v1578_v16 = vadd.f32 %v1274_v14, %v542_v10  ;;  %v1580_v17 = vadd.f32 %v1356_v15, %v550_v11  ;;  %v1276_v18 = vpop.f32.mrb[9].mxu0  ;;  %v1358_v19 = vpop.f32.mrb[9].mxu1 }
 0x262   :  { %v1579_v20 = vadd.f32 %v1276_v18, %v546_v12  ;;  %v1581_v21 = vadd.f32 %v1358_v19, %v554_v13  ;;  %v1278_v22 = vpop.f32.mrb[10].mxu0  ;;  %v1360_v23 = vpop.f32.mrb[10].mxu1 }
 0x263   :  { %v1363_v24 = vpack.c.bf16 %v1578_v16, %v1578_v16  ;;  %v1365_v25 = vpack.c.bf16 %v1580_v17, %v1580_v17  ;;  %v1279_v26 = vpop.f32.mrb[11].mxu0  ;;  %v1361_v27 = vpop.f32.mrb[11].mxu1 }
 0x264   :  { %v1364_v29 = vpack.c.bf16 %v1579_v20, %v1579_v20  ;;  %v1366_v31 = vpack.c.bf16 %v1581_v21, %v1581_v21 }
 0x265   :  { %v1367_v33 = vmul.bf16 1009007652, %v1363_v24  ;;  %v1369_v34 = vmul.bf16 1009007652, %v1365_v25 }
 0x266   :  { %v1368_v35 = vmul.bf16 1009007652, %v1364_v29  ;;  %v1370_v36 = vmul.bf16 1009007652, %v1366_v31 }
 0x267   :  { %v1371_v37 = vmax.bf16 %v1367_v33, %v1363_v24  ;;  %v1373_v39 = vmax.bf16 %v1369_v34, %v1365_v25 }
 0x268   :  { %v1372_v40 = vmax.bf16 %v1368_v35, %v1364_v29  ;;  %v1374_v43 = vmax.bf16 %v1370_v36, %v1366_v31 }
 0x269   :  { %v1376_v44 = vunpack.c.l.bf16 %v1371_v37  ;;  %v1378_v46 = vunpack.c.l.bf16 %v1373_v39 }
 0x26a   :  { %v1377_v47 = vunpack.c.l.bf16 %v1372_v40  ;;  %v1379_v51 = vunpack.c.l.bf16 %v1374_v43 }
 0x26b   :  { %v1401_v49 = vmul.f32 %v1384_v38, %v1376_v44  ;;  %v1403_v53 = vmul.f32 %v1392_v48, %v1378_v46 }
 0x26c   :  { %v1402_v50 = vmul.f32 %v1388_v41, %v1377_v47  ;;  %v1404_v55 = vmul.f32 %v1396_v52, %v1379_v51 }
 0x26e   :  { %v1405_v54 = vadd.f32 %v1402_v50, %v1401_v49 }
 0x270   :  { %v1406_v56 = vadd.f32 %v1405_v54, %v1403_v53 }
 0x272   :  { %v1407_v30 = vadd.f32 %v1406_v56, %v1404_v55 }
 0x274   :  { %1408 = vadd.xlane.f32.xlu0 %v1407_v30 }
 0x301   :  { %v1409_v58 = vpop.xlane.xlu0 %1408 }
 0x302   :  { %v1417_v32 = vadd.f32 %v1577_v57, %v1409_v58 }
 0x304   :  { %v1418_v59 = vmul.f32 0.01, %v1417_v32 }
 0x306   :  { %v1419_v61 = vmax.f32 %v1417_v32, %v1418_v59 }
 0x308   :  { %1421 = vst.msk [vmem:[%s2109_s9] sm:$0xff] %vm1420_vm1, %v1419_v61 }
 0x309   :  { %1426 = vsyncpa [#allocation4], 1 }
 0x30a   :  { %1427 = vsyncpa [#allocation6], 1 }
 0x30b   :  { %1428 = vsyncpa [#allocation9], 1 }

</bundles_post_ra>
